<compile_context>
chip_gen: v7x
topology: tpu7x:2x2x1
jax: 0.10.0
libtpu: 0.0.40
codegen_flags: <defaults>
</compile_context>

<pallas_src>
import functools

import jax
import jax.numpy as jnp
from jax.experimental import pallas as pl
from jax.experimental.pallas import tpu as pltpu


def _round_up(x, m):
    return (x + m - 1) // m * m


def _next_pow2(x):
    return 1 if x <= 1 else 1 << (int(x) - 1).bit_length()


# ---------------------------------------------------------------------------
# Activations
# ---------------------------------------------------------------------------
def _activation_kernel(y, act):
    """In-kernel activation. Mish uses a single-exp reformulation:
    mish(y) = y*tanh(softplus(y)) = y * n/(n+2), n = e*(e+2), e = exp(y)."""
    if act == "mish":
        # For y > 20, n/(n+2) == 1 in f32 (mish(y) = y); clamp keeps n in range.
        e = jnp.exp(jnp.minimum(y, 20.0))
        n = e * (e + 2.0)
        return y * n * pl.reciprocal(n + 2.0, approx=True)
    elif act == "relu":
        return jnp.maximum(y, 0.0)
    elif act == "leaky":
        return jnp.where(y >= 0.0, y, 0.1 * y)
    elif act == "none":
        return y
    raise ValueError(f"unknown activation {act}")


def _activation_ref(y, act):
    """Plain-JAX activation matching the PyTorch definition (for the check)."""
    if act == "mish":
        return y * jnp.tanh(jnp.logaddexp(y, 0.0))
    elif act == "relu":
        return jnp.maximum(y, 0.0)
    elif act == "leaky":
        return jnp.where(y >= 0.0, y, 0.1 * y)
    elif act == "none":
        return y
    raise ValueError(f"unknown activation {act}")


# ---------------------------------------------------------------------------
# Pass 1: conv matmul + per-channel sum / sum-of-squares (+ optional conv output)
# ---------------------------------------------------------------------------
def _stats_update(y, sum_ref, ssq_ref):
    # Accumulate into an (8, Cp) resident block: only same-lane/sublane VPU adds per
    # tile; the cross-sublane collapse of the 8 rows happens once, in glue.
    yr = y.reshape(y.shape[0] // 8, 8, y.shape[1])
    sum_ref[...] += jnp.sum(yr, axis=0)
    ssq_ref[...] += jnp.sum(yr * yr, axis=0)


def _stats_kernel(p_ref, w_ref, sum_ref, ssq_ref):
    @pl.when(pl.program_id(1) == 0)
    def _():
        sum_ref[...] = jnp.zeros_like(sum_ref)
        ssq_ref[...] = jnp.zeros_like(ssq_ref)

    y = jnp.dot(p_ref[...], w_ref[...], preferred_element_type=jnp.float32)
    # Padded rows/cols are exactly zero, so they contribute nothing to the stats.
    _stats_update(y, sum_ref, ssq_ref)


def _stats_y_kernel(p_ref, w_ref, y_ref, sum_ref, ssq_ref):
    @pl.when(pl.program_id(1) == 0)
    def _():
        sum_ref[...] = jnp.zeros_like(sum_ref)
        ssq_ref[...] = jnp.zeros_like(ssq_ref)

    y = jnp.dot(p_ref[...], w_ref[...], preferred_element_type=jnp.float32)
    y_ref[...] = y.astype(y_ref.dtype)        # bf16 intermediate; stats stay f32
    _stats_update(y, sum_ref, ssq_ref)


# ---------------------------------------------------------------------------
# Pass 2: (optionally recompute conv) + batch-norm + activation
# ---------------------------------------------------------------------------
def _gemm_bn_act_kernel(p_ref, w_ref, scale_ref, shift_ref, o_ref, *, act):
    # Small-K path: recompute the conv matmul (both passes are far below the compute
    # roofline) instead of round-tripping an (Mp, Cp) intermediate through HBM.
    y = jnp.dot(p_ref[...], w_ref[...], preferred_element_type=jnp.float32)
    y = y * scale_ref[...] + shift_ref[...]
    o_ref[...] = _activation_kernel(y, act).astype(o_ref.dtype)


def _bn_act_kernel(y_ref, scale_ref, shift_ref, o_ref, *, act):
    y = y_ref[...].astype(jnp.float32) * scale_ref[...] + shift_ref[...]
    o_ref[...] = _activation_kernel(y, act).astype(o_ref.dtype)


# ---------------------------------------------------------------------------
# Wrapper
# ---------------------------------------------------------------------------
def conv_bn_activation(x_nchw, weight, bias, gamma, beta, *, stride=1, padding=0,
                       dilation=1, groups=1, activation="mish", eps=1e-5,
                       compute_dtype=jnp.bfloat16, out_dtype=jnp.float32,
                       out_layout="NCHW"):
    """Forward of ConvBnActivation. x_nchw: (N, Cin, H, W) float32."""
    if groups != 1:
        # TODO(synk): grouped convolution not implemented (groups == 1 only).
        raise NotImplementedError("groups > 1 not supported")
    del bias  # cancels exactly through training-mode BatchNorm (mean subtraction)

    N, Cin, H, W = x_nchw.shape
    Cout, _, KH, KW = weight.shape
    OH = (H + 2 * padding - dilation * (KH - 1) - 1) // stride + 1
    OW = (W + 2 * padding - dilation * (KW - 1) - 1) // stride + 1
    M = N * OH * OW
    K = KH * KW * Cin
    Kp = _round_up(K, 128)
    Cp = _round_up(Cout, 128)
    ib = jnp.dtype(compute_dtype).itemsize
    ob = jnp.dtype(out_dtype).itemsize

    # Recompute the matmul in pass 2 when re-reading the patches tile is cheaper than
    # writing + re-reading an (Mp, Cp) compute-dtype intermediate.
    recompute = Kp < 2 * Cp

    # --- per-generation VMEM budget -------------------------------------------------
    try:
        phys_vmem = int(pltpu.get_tpu_info().vmem_capacity_bytes)
    except Exception:
        phys_vmem = 64 * 1024 * 1024
    if phys_vmem >= 128 * 1024 * 1024:
        vmem_budget = 96 * 1024 * 1024                       # v5e / v6e (128 MiB parts)
    else:
        vmem_budget = max(phys_vmem - 16 * 1024 * 1024,      # v7x: ~48 MiB of 64
                          phys_vmem // 2)
    tile_target = int(vmem_budget * 0.85)

    SPLIT = 2 if _round_up(M, 8) >= 16 else 1    # pass-1 megacore split (v7x: 2 TCs)

    def _pick_tile(row_bytes, fixed_bytes, cap_rows):
        tm = 4096
        while tm > 128 and fixed_bytes + tm * row_bytes > tile_target:
            tm //= 2
        return max(8, min(tm, _next_pow2(cap_rows)))

    # Pass-1 / pass-2 tiles are decoupled (pass 2 has no Kp term on the large-K path).
    row1 = 2 * Kp * ib + (0 if recompute else 2 * Cp * ib)   # double-buffered tiles
    fixed1 = Kp * Cp * ib + 4 * 8 * Cp * 4                   # resident weight + stats
    tile_m1 = _pick_tile(row1, fixed1, (M + SPLIT - 1) // SPLIT)

    if recompute:
        row2 = 2 * Kp * ib + 2 * Cp * ob
        fixed2 = Kp * Cp * ib + 4 * Cp * 4
    else:
        row2 = 2 * Cp * ib + 2 * Cp * ob
        fixed2 = 4 * Cp * 4
    tile_m2 = _pick_tile(row2, fixed2, M)

    # SPLIT*tile_m1 and tile_m2 are both powers of two, so padding M to the larger one
    # keeps both grids exact.
    Mp = _round_up(M, max(SPLIT * tile_m1, tile_m2))
    inner1 = Mp // (SPLIT * tile_m1)
    grid2 = Mp // tile_m2

    # --- glue: NCHW -> NHWC, cast to compute dtype BEFORE im2col, pad ----------------
    x = jnp.transpose(x_nchw, (0, 2, 3, 1)).astype(compute_dtype)
    x = jnp.pad(x, ((0, 0), (padding, padding), (padding, padding), (0, 0)))
    cols = []
    for kh in range(KH):
        for kw in range(KW):
            hs, ws = kh * dilation, kw * dilation
            cols.append(x[:, hs: hs + (OH - 1) * stride + 1: stride,
                             ws: ws + (OW - 1) * stride + 1: stride, :])
    # TODO(synk): implicit GEMM — stream the padded NHWC input into pass 1 and build
    #             the patch tiles in VMEM instead of materializing im2col in HBM.
    patches = jnp.concatenate(cols, axis=-1).reshape(M, K)
    patches = jnp.pad(patches, ((0, Mp - M), (0, Kp - K)))

    w2 = jnp.transpose(weight, (2, 3, 1, 0)).reshape(K, Cout)
    w2 = jnp.pad(w2, ((0, Kp - K), (0, Cp - Cout))).astype(compute_dtype)

    # --- pass 1: conv matmul + per-channel stats -------------------------------------
    p_spec1 = pl.BlockSpec((tile_m1, Kp), lambda c, i: (c * inner1 + i, 0))
    w_spec1 = pl.BlockSpec((Kp, Cp), lambda c, i: (0, 0))          # resident weight
    stats_shape = jax.ShapeDtypeStruct((SPLIT * 8, Cp), jnp.float32)
    stats_spec = pl.BlockSpec((8, Cp), lambda c, i: (c, 0))        # per-core rows
    cparams1 = pltpu.CompilerParams(
        dimension_semantics=("parallel", "arbitrary"),
        vmem_limit_bytes=vmem_budget)

    if recompute:
        cost1 = pl.CostEstimate(
            flops=2 * Mp * Kp * Cp, transcendentals=0,
            bytes_accessed=Mp * Kp * ib + Kp * Cp * ib + 2 * SPLIT * 8 * Cp * 4)
        ch_sum, ch_ssq = pl.pallas_call(
            _stats_kernel,
            out_shape=(stats_shape, stats_shape),
            grid=(SPLIT, inner1),
            in_specs=[p_spec1, w_spec1],
            out_specs=(stats_spec, stats_spec),
            compiler_params=cparams1,
            cost_estimate=cost1,
        )(patches, w2)
        y_conv = None
    else:
        cost1 = pl.CostEstimate(
            flops=2 * Mp * Kp * Cp, transcendentals=0,
            bytes_accessed=(Mp * Kp * ib + Kp * Cp * ib + Mp * Cp * ib
                            + 2 * SPLIT * 8 * Cp * 4))
        y_conv, ch_sum, ch_ssq = pl.pallas_call(
            _stats_y_kernel,
            out_shape=(jax.ShapeDtypeStruct((Mp, Cp), compute_dtype),
                       stats_shape, stats_shape),
            grid=(SPLIT, inner1),
            in_specs=[p_spec1, w_spec1],
            out_specs=(pl.BlockSpec((tile_m1, Cp), lambda c, i: (c * inner1 + i, 0)),
                       stats_spec, stats_spec),
            compiler_params=cparams1,
            cost_estimate=cost1,
        )(patches, w2)

    # --- glue: BN scale/shift from global-batch statistics (tiny (Cp,) arrays) -------
    inv_m = 1.0 / float(M)
    mean = jnp.sum(ch_sum, axis=0) * inv_m
    var = jnp.maximum(jnp.sum(ch_ssq, axis=0) * inv_m - mean * mean, 0.0)
    g_p = jnp.pad(gamma.astype(jnp.float32), (0, Cp - Cout))
    b_p = jnp.pad(beta.astype(jnp.float32), (0, Cp - Cout))
    scale = g_p * jax.lax.rsqrt(var + eps)
    shift = b_p - mean * scale          # padded lanes: gamma=0 -> scale=shift=0
    scale = scale.reshape(1, Cp)
    shift = shift.reshape(1, Cp)

    # --- pass 2: (recompute conv +) normalize + activation ---------------------------
    n_transc = Mp * Cp if activation == "mish" else 0
    cparams2 = pltpu.CompilerParams(
        dimension_semantics=("parallel",),
        vmem_limit_bytes=vmem_budget)
    if recompute:
        cost2 = pl.CostEstimate(
            flops=2 * Mp * Kp * Cp + 4 * Mp * Cp, transcendentals=n_transc,
            bytes_accessed=Mp * Kp * ib + Kp * Cp * ib + Mp * Cp * ob + 2 * Cp * 4)
        out_flat = pl.pallas_call(
            functools.partial(_gemm_bn_act_kernel, act=activation),
            out_shape=jax.ShapeDtypeStruct((Mp, Cp), out_dtype),
            grid=(grid2,),
            in_specs=[pl.BlockSpec((tile_m2, Kp), lambda i: (i, 0)),
                      pl.BlockSpec((Kp, Cp), lambda i: (0, 0)),
                      pl.BlockSpec((1, Cp), lambda i: (0, 0)),
                      pl.BlockSpec((1, Cp), lambda i: (0, 0))],
            out_specs=pl.BlockSpec((tile_m2, Cp), lambda i: (i, 0)),
            compiler_params=cparams2,
            cost_estimate=cost2,
        )(patches, w2, scale, shift)
    else:
        cost2 = pl.CostEstimate(
            flops=4 * Mp * Cp, transcendentals=n_transc,
            bytes_accessed=Mp * Cp * ib + Mp * Cp * ob + 2 * Cp * 4)
        out_flat = pl.pallas_call(
            functools.partial(_bn_act_kernel, act=activation),
            out_shape=jax.ShapeDtypeStruct((Mp, Cp), out_dtype),
            grid=(grid2,),
            in_specs=[pl.BlockSpec((tile_m2, Cp), lambda i: (i, 0)),
                      pl.BlockSpec((1, Cp), lambda i: (0, 0)),
                      pl.BlockSpec((1, Cp), lambda i: (0, 0))],
            out_specs=pl.BlockSpec((tile_m2, Cp), lambda i: (i, 0)),
            compiler_params=cparams2,
            cost_estimate=cost2,
        )(y_conv, scale, shift)

    # --- output layout ---------------------------------------------------------------
    out_nhwc = out_flat[:M, :Cout].reshape(N, OH, OW, Cout)
    if out_layout == "NHWC":
        return out_nhwc   # preferred: skips the extra NHWC->NCHW HBM pass
    return jnp.transpose(out_nhwc, (0, 3, 1, 2))


# ---------------------------------------------------------------------------
# Plain-JAX reference (PyTorch-faithful, includes the conv bias)
# ---------------------------------------------------------------------------
def _reference(x_nchw, weight, bias, gamma, beta, *, stride, padding, dilation,
               activation, eps=1e-5):
    y = jax.lax.conv_general_dilated(
        x_nchw, weight, window_strides=(stride, stride),
        padding=((padding, padding), (padding, padding)),
        rhs_dilation=(dilation, dilation),
        dimension_numbers=("NCHW", "OIHW", "NCHW"),
    ) + bias.reshape(1, -1, 1, 1)
    mean = jnp.mean(y, axis=(0, 2, 3), keepdims=True)
    var = jnp.mean((y - mean) ** 2, axis=(0, 2, 3), keepdims=True)
    y = (y - mean) * jax.lax.rsqrt(var + eps)
    y = gamma.reshape(1, -1, 1, 1) * y + beta.reshape(1, -1, 1, 1)
    return _activation_ref(y, activation)


if __name__ == "__main__":
    # Module config: ConvBnActivation(in=4, out=8, kernel=3, stride=1, padding=1,
    #                                  bias=True, activation='mish')
    N, Cin, Cout, H, W, Ksz = 2, 4, 8, 16, 16, 3
    stride, padding, dilation = 1, 1, 1
    activation = "mish"

    key = jax.random.PRNGKey(0)
    kx, kw, kb, kg, kbt = jax.random.split(key, 5)
    x = jax.random.normal(kx, (N, Cin, H, W), dtype=jnp.float32)
    weight = jax.random.normal(kw, (Cout, Cin, Ksz, Ksz), dtype=jnp.float32) * 0.1
    bias = jax.random.normal(kb, (Cout,), dtype=jnp.float32) * 0.1
    gamma = 1.0 + 0.1 * jax.random.normal(kg, (Cout,), dtype=jnp.float32)
    beta = 0.1 * jax.random.normal(kbt, (Cout,), dtype=jnp.float32)

    # Tolerance note: Mish uses the hardware approximate reciprocal and BN uses
    # sum/sumsq statistics, so we check at 2e-2 (catches any structural bug).

    # ---- f32 MXU-input path (small-K => recompute structure) vs faithful reference.
    out_f32 = conv_bn_activation(x, weight, bias, gamma, beta,
                                 stride=stride, padding=padding, dilation=dilation,
                                 activation=activation, compute_dtype=jnp.float32)
    out_f32 = jax.block_until_ready(out_f32)
    ref = _reference(x, weight, bias, gamma, beta, stride=stride, padding=padding,
                     dilation=dilation, activation=activation)
    assert out_f32.shape == (N, Cout, H, W), out_f32.shape
    assert jnp.allclose(out_f32, ref, atol=2e-2, rtol=2e-2), \
        float(jnp.max(jnp.abs(out_f32 - ref)))

    # ---- bf16 MXU-input path (default) vs a reference whose conv inputs are
    #      quantized to bf16 the same way, keeping the comparison tight.
    out_bf16 = conv_bn_activation(x, weight, bias, gamma, beta,
                                  stride=stride, padding=padding, dilation=dilation,
                                  activation=activation, compute_dtype=jnp.bfloat16)
    out_bf16 = jax.block_until_ready(out_bf16)
    x_q = x.astype(jnp.bfloat16).astype(jnp.float32)
    w_q = weight.astype(jnp.bfloat16).astype(jnp.float32)
    ref_q = _reference(x_q, w_q, bias, gamma, beta, stride=stride, padding=padding,
                       dilation=dilation, activation=activation)
    assert out_bf16.shape == (N, Cout, H, W), out_bf16.shape
    assert jnp.allclose(out_bf16, ref_q, atol=2e-2, rtol=2e-2), \
        float(jnp.max(jnp.abs(out_bf16 - ref_q)))

    # ---- second config (Cin=16 -> Kp=256 >= 2*Cp) exercising the large-K path that
    #      keeps a bf16 conv intermediate between the two passes.
    N2, Cin2, Cout2, H2, W2 = 1, 16, 8, 8, 8
    kx2, kw2, kb2, kg2, kbt2 = jax.random.split(jax.random.PRNGKey(1), 5)
    x2 = jax.random.normal(kx2, (N2, Cin2, H2, W2), dtype=jnp.float32)
    w2_ = jax.random.normal(kw2, (Cout2, Cin2, Ksz, Ksz), dtype=jnp.float32) * 0.1
    b2_ = jax.random.normal(kb2, (Cout2,), dtype=jnp.float32) * 0.1
    g2_ = 1.0 + 0.1 * jax.random.normal(kg2, (Cout2,), dtype=jnp.float32)
    bt2_ = 0.1 * jax.random.normal(kbt2, (Cout2,), dtype=jnp.float32)
    out2 = conv_bn_activation(x2, w2_, b2_, g2_, bt2_, stride=1, padding=1,
                              dilation=1, activation="leaky",
                              compute_dtype=jnp.bfloat16)
    out2 = jax.block_until_ready(out2)
    x2_q = x2.astype(jnp.bfloat16).astype(jnp.float32)
    w2_q = w2_.astype(jnp.bfloat16).astype(jnp.float32)
    ref2 = _reference(x2_q, w2_q, b2_, g2_, bt2_, stride=1, padding=1, dilation=1,
                      activation="leaky")
    assert out2.shape == (N2, Cout2, H2, W2), out2.shape
    assert jnp.allclose(out2, ref2, atol=2e-2, rtol=2e-2), \
        float(jnp.max(jnp.abs(out2 - ref2)))

    print("KERNEL_OK")
</pallas_src>

<mosaic_0001>
module attributes {stable_mosaic.version = 11 : i64} {
  func.func @_stats_kernel(%arg0: i32, %arg1: i32, %arg2: memref<256x128xf32, #tpu.memory_space<vmem>>, %arg3: memref<128x128xf32, #tpu.memory_space<vmem>>, %arg4: memref<8x128xf32, #tpu.memory_space<vmem>>, %arg5: memref<8x128xf32, #tpu.memory_space<vmem>>) attributes {dimension_semantics = [#tpu.dimension_semantics<parallel>, #tpu.dimension_semantics<arbitrary>], iteration_bounds = array<i64: 2, 1>, scalar_prefetch = 0 : i64, scratch_operands = 0 : i64, tpu.core_type = #tpu.core_type<tc>, window_params = [{transform_indices = @transform_0, window_bounds = array<i64: 256, 128>}, {pipeline_mode = #tpu.pipeline_mode<synchronous>, transform_indices = @transform_1, window_bounds = array<i64: 128, 128>}, {transform_indices = @transform_2, window_bounds = array<i64: 8, 128>}, {transform_indices = @transform_3, window_bounds = array<i64: 8, 128>}]} {
    %c0_i32 = arith.constant 0 : i32
    %0 = arith.cmpi eq, %arg1, %c0_i32 : i32
    %1 = arith.extui %0 : i1 to i32
    %c0_i32_0 = arith.constant 0 : i32
    %2 = arith.cmpi ne, %1, %c0_i32_0 : i32
    scf.if %2 {
      %cst_14 = arith.constant 0.000000e+00 : f32
      %16 = vector.broadcast %cst_14 : f32 to vector<8x128xf32>
      %c0_15 = arith.constant 0 : index
      %c0_16 = arith.constant 0 : index
      %17 = vector.load %arg4[%c0_15, %c0_16] : memref<8x128xf32, #tpu.memory_space<vmem>>, vector<8x128xf32>
      tpu.vector_store %arg4[%c0_15, %c0_16], %16 {strides = array<i32>} : memref<8x128xf32, #tpu.memory_space<vmem>>, vector<8x128xf32>,
      %cst_17 = arith.constant 0.000000e+00 : f32
      %18 = vector.broadcast %cst_17 : f32 to vector<8x128xf32>
      %c0_18 = arith.constant 0 : index
      %c0_19 = arith.constant 0 : index
      %19 = vector.load %arg5[%c0_18, %c0_19] : memref<8x128xf32, #tpu.memory_space<vmem>>, vector<8x128xf32>
      tpu.vector_store %arg5[%c0_18, %c0_19], %18 {strides = array<i32>} : memref<8x128xf32, #tpu.memory_space<vmem>>, vector<8x128xf32>,
    } else {
    }
    %c0 = arith.constant 0 : index
    %c0_1 = arith.constant 0 : index
    %3 = vector.load %arg2[%c0, %c0_1] : memref<256x128xf32, #tpu.memory_space<vmem>>, vector<256x128xf32>
    %c0_2 = arith.constant 0 : index
    %c0_3 = arith.constant 0 : index
    %4 = vector.load %arg3[%c0_2, %c0_3] : memref<128x128xf32, #tpu.memory_space<vmem>>, vector<128x128xf32>
    %cst = arith.constant dense<0.000000e+00> : vector<256x128xf32>
    %5 = tpu.matmul %3, %4, %cst {dimension_numbers = #tpu.dot_dimension_numbers<[1], [0], [0], [1], [0, 0, 1, 1], [], []>} : vector<256x128xf32>, vector<128x128xf32>, vector<256x128xf32> -> vector<256x128xf32>
    %6 = vector.shape_cast %5 : vector<256x128xf32> to vector<32x8x128xf32>
    %c0_4 = arith.constant 0 : index
    %c0_5 = arith.constant 0 : index
    %7 = vector.load %arg4[%c0_4, %c0_5] : memref<8x128xf32, #tpu.memory_space<vmem>>, vector<8x128xf32>
    %cst_6 = arith.constant dense<0.000000e+00> : vector<8x128xf32>
    %8 = vector.multi_reduction <add>, %6, %cst_6 [0] : vector<32x8x128xf32> to vector<8x128xf32>
    %9 = arith.addf %7, %8 : vector<8x128xf32>
    %c0_7 = arith.constant 0 : index
    %c0_8 = arith.constant 0 : index
    %10 = vector.load %arg4[%c0_7, %c0_8] : memref<8x128xf32, #tpu.memory_space<vmem>>, vector<8x128xf32>
    tpu.vector_store %arg4[%c0_7, %c0_8], %9 {strides = array<i32>} : memref<8x128xf32, #tpu.memory_space<vmem>>, vector<8x128xf32>,
    %c0_9 = arith.constant 0 : index
    %c0_10 = arith.constant 0 : index
    %11 = vector.load %arg5[%c0_9, %c0_10] : memref<8x128xf32, #tpu.memory_space<vmem>>, vector<8x128xf32>
    %12 = arith.mulf %6, %6 : vector<32x8x128xf32>
    %cst_11 = arith.constant dense<0.000000e+00> : vector<8x128xf32>
    %13 = vector.multi_reduction <add>, %12, %cst_11 [0] : vector<32x8x128xf32> to vector<8x128xf32>
    %14 = arith.addf %11, %13 : vector<8x128xf32>
    %c0_12 = arith.constant 0 : index
    %c0_13 = arith.constant 0 : index
    %15 = vector.load %arg5[%c0_12, %c0_13] : memref<8x128xf32, #tpu.memory_space<vmem>>, vector<8x128xf32>
    tpu.vector_store %arg5[%c0_12, %c0_13], %14 {strides = array<i32>} : memref<8x128xf32, #tpu.memory_space<vmem>>, vector<8x128xf32>,
    return
  }
  func.func @transform_0(%arg0: i32, %arg1: i32) -> (i32, i32) {
    %c1_i32 = arith.constant 1 : i32
    %0 = arith.muli %arg0, %c1_i32 : i32
    %1 = arith.addi %0, %arg1 : i32
    %c0_i32 = arith.constant 0 : i32
    %c0_i32_0 = arith.constant 0 : i32
    return %1, %c0_i32 : i32, i32
  }
  func.func @transform_1(%arg0: i32, %arg1: i32) -> (i32, i32) {
    %c0_i32 = arith.constant 0 : i32
    %c0_i32_0 = arith.constant 0 : i32
    %c0_i32_1 = arith.constant 0 : i32
    return %c0_i32, %c0_i32_0 : i32, i32
  }
  func.func @transform_2(%arg0: i32, %arg1: i32) -> (i32, i32) {
    %c0_i32 = arith.constant 0 : i32
    %c0_i32_0 = arith.constant 0 : i32
    return %arg0, %c0_i32 : i32, i32
  }
  func.func @transform_3(%arg0: i32, %arg1: i32) -> (i32, i32) {
    %c0_i32 = arith.constant 0 : i32
    %c0_i32_0 = arith.constant 0 : i32
    return %arg0, %c0_i32 : i32, i32
  }
}

</mosaic_0001>

<bundles_post_ra>
// kernel: tpu_custom_call.1
= control target key start
LH: loop header
LB: loop body
LE: loop exit
PB: predicated region body
PF: predicated region fallthrough
CT: control target
= control target key end

     0   :  { %9 = vsyncpa [#allocation3], 0  ;;  %s1586_s0 = inlined_call_operand.hbm [shape: f32[512,128], index: 0, kind: input, shape index: {}]   ;;  %s1587_s1 = inlined_call_operand.hbm [shape: f32[128,128], index: 1, kind: input, shape index: {}]   ;;  %s1588_s2 = inlined_call_operand.hbm [shape: f32[16,128], index: 2, kind: output, shape index: {0}]   ;;  %s1589_s3 = inlined_call_operand.hbm [shape: f32[16,128], index: 3, kind: output, shape index: {1}]  }
   0x1   :  { %11 = vsyncpa [#allocation3 + $0x1], 0 }
   0x2   :  { %12 = vsyncpa [#allocation6], 0 }
   0x3   :  { %13 = vsyncpa [#allocation4], 0 }
   0x4   :  { %15 = vsyncpa [#allocation4 + $0x1], 0 }
   0x5   :  { %16 = vsyncpa [#allocation9], 0 }
   0x6   :  { %18 = vsyncpa [#allocation9 + $0x1], 0  ;;  %s1245_s12 = smov 0   ;;  %s1247_s13 = smov 0  }
   0x7   :  { %s1249_s14 = smov 0   ;;  %s1251_s15 = smov 0  }
   0x8   :  { %s1253_s16 = smov 0   ;;  %s1255_s17 = smov 0  }
   0x9 LB: > { %s764_s18 = sadd.s32 4294967295, %s1217_s17   ;;  %s765_s19 = sadd.s32 4294967294, %s1217_s17   ;;  %s1217_s17 = sphi %s1255_s17, %s24_s17   ;;  %s1213_s16 = sphi %s1253_s16, %s1613_s16   ;;  %s1209_s15 = sphi %s1251_s15, %s1612_s15   ;;  %s1205_s14 = sphi %s1249_s14, %s1611_s14   ;;  %s1201_s13 = sphi %s1247_s13, %s1610_s13   ;;  %s1197_s12 = sphi %s1245_s12, %s1609_s12  }
   0xa   : > { %p58_p0 = scmp.ne.s32.totalorder %s1201_s13, %s1197_s12  ;;  %p1279_p1 = scmp.eq.s32.totalorder %s764_s18, 0 }
   0xb   : > { %p1283_p2 = scmp.eq.s32.totalorder %s764_s18, 1  ;;  %p109_p3 = scmp.eq.s32.totalorder %s765_s19, 1 }
   0xc   : > { %s1594_s20 = scalar_select %p1279_p1, 1, 0 }
   0xd   : > { %s1595_s21 = scalar_select %p1283_p2, 1, 0 }
   0xe   : > { %p1289_p4 = por %p1279_p1, %p58_p0  ;;  %p766_p5 = scmp.ge.s32.totalorder %s1217_s17, 1 }
   0xf   : > { %p1294_p6 = por %p109_p3, %p58_p0  ;;  %p142_p7 = scmp.lt.s32.totalorder %s1217_s17, 3 }
  0x10   : > { %s1596_s22 = scalar_select %p1289_p4, 1, 0 }
  0x11   : > { %s1597_s23 = scalar_select %p1294_p6, 1, 0 }
  0x12   : > { %p1299_p8 = pnand %p766_p5, %p142_p7  ;;  %s1219_s25 = smov [#allocation5]  }
  0x13   : > { %s154_s26 = sshll.u32 %s1219_s25, 4  ;;  %s36_s28 = sadd.s32 1, %s1213_s16  ;;  %s155_s26 = int_to_ptr.vmem [resolvable:$true] %s154_s26 }
  0x14   : > { %s1598_s24 = scalar_select %p1299_p8, 1, 0 }
  0x15   : > { %p970_p9 = pneg %p1299_p8  ;;  %s1041_s4 = scalar_lea.hbm %s1587_s1, 2048 }
  0x16   : > { %p1042_p12 = scmp.ne.s32.totalorder %s1587_s1, %s1041_s4  ;;  %p1048_p5 = scmp.lt.u32.totalorder %s1041_s4, %s1587_s1 }
  0x17   : > { %p1308_p11 = pnand %p970_p9, %p1279_p1 }
  0x19   : > { %p1043_p13 = pneg %p1308_p11 }
  0x1b   : > { %p1044_p0 = pnand %p1043_p13, %p1042_p12 }
  0x1d   : > { %p1045_p3 = pneg %p1044_p0 }
  0x1f   : > { %p1050_p7 = pnand %p1048_p5, %p1045_p3 }
  0x21   : > { %1053 = shalt.err (!%p1050_p7)
}
  0x22   : > { %s1054_s9 = scalar_lea.vmem %s155_s26, 2048  ;;  %p1062_p1 = scmp.lt.s32.totalorder %s155_s26, %s155_s26 }
  0x23   : > { %p1055_p9 = scmp.ne.s32.totalorder %s155_s26, %s1054_s9  ;;  %p1063_p4 = scmp.lt.s32.totalorder %s1054_s9, %s1054_s9 }
  0x25   : > { %p1057_p10 = pnand %p1055_p9, %p1043_p13  ;;  %p1064_p8 = por %p1063_p4, %p1062_p1 }
  0x27   : > { %p1058_p6 = pneg %p1057_p10 }
  0x29   : > { %p1065_p2 = pnand %p1064_p8, %p1058_p6 }
  0x2b   : > { %1068 = shalt.err (!%p1065_p2)
}
  0x2c   : > { %s1220_s10 = smov 128   ;;  %s1221_s11 = smov 8  }
  0x2d   : > { %973 = dma.hbm_to_vmem [thread:$0]  (!%p1308_p11), %s1587_s1, 2048, %s155_s26, [#allocation6], %s1220_s10, %s1220_s10, %s1221_s11  }
  0x2e   : > { %p38_p1 = scmp.ge.s32.totalorder %s36_s28, 2  ;;  %s45_s25 = sadd.s32 1, %s1205_s14 }
  0x2f   : > { %p52_p2 = scmp.ne.s32.totalorder %s1205_s14, %s1201_s13  ;;  %p53_p4 = scmp.eq.s32.totalorder %s1217_s17, 0 }
  0x30   : > { %s1615_s28 = smov (%p38_p1, %s36_s28), 0  ;;  %p1601_p8 = scmp.ne.s32.totalorder %s1595_s21, 0 }
  0x31   : > { %p1338_p6 = por %p53_p4, %p52_p2  ;;  %s42_s30 = ssub.s32 %s1213_s16, %s1615_s28 }
  0x32   : > { %p1344_p10 = por %p1601_p8, %p52_p2  ;;  %p986_p12 = scmp.lt.s32.totalorder %s1217_s17, 2 }
  0x33   : > { %p43_p11 = scmp.eq.s32.totalorder %s42_s30, 0  ;;  %s168_s26 = sand.u32 1, %s1205_s14  }
  0x34   : > { %s769_s4 = sshll.u32 %s168_s26, 8  ;;  %s783_s6 = sshll.u32 %s1213_s16, 12 }
  0x35   : > { %s1353_s5 = scalar_select %p43_p11, %s1205_s14, %s45_s25  }
  0x36   : > { %s1359_s9 = scalar_lea.hbm %s1586_s0, %s783_s6  ;;  %s172_s21 = scalar_lea.vmem [#allocation2], %s769_s4 }
  0x37   : > { %s180_s18 = sshll.u32 %s172_s21, 4  ;;  %p1365_p13 = pnand %p986_p12, %p1338_p6  ;;  %s1361_s18 = int_to_ptr.vmem [resolvable:$true] %s180_s18 }
  0x38   : > { %s1369_s25 = scalar_lea.sflag [#allocation3], %s168_s26  ;;  %s1069_s30 = scalar_lea.hbm %s1359_s9, 4096 }
  0x39   : > { %p1070_p0 = scmp.ne.s32.totalorder %s1359_s9, %s1069_s30  ;;  %p1071_p3 = pneg %p1365_p13 }
  0x3a   : > { %s1074_s29 = scalar_lea.hbm %s1586_s0, 8192  ;;  %p1075_p9 = scmp.lt.u32.totalorder %s1359_s9, %s1586_s0 }
  0x3b   : > { %p1072_p5 = pnand %p1071_p3, %p1070_p0  ;;  %p1076_p1 = scmp.lt.u32.totalorder %s1074_s29, %s1069_s30 }
  0x3c   : > { %p1078_p4 = scmp.lt.u32.totalorder %s1069_s30, %s1359_s9 }
  0x3d   : > { %p1073_p7 = pneg %p1072_p5  ;;  %p1077_p2 = por %p1076_p1, %p1075_p9 }
  0x3f   : > { %p1079_p6 = por %p1078_p4, %p1077_p2 }
  0x41   : > { %p1080_p8 = pnand %p1079_p6, %p1073_p7 }
  0x43   : > { %1083 = shalt.err (!%p1080_p8)
}
  0x44   : > { %s1084_s26 = scalar_lea.vmem %s1361_s18, 4096  ;;  %s1222_s21 = smov [#allocation2]  }
  0x45   : > { %p1085_p12 = scmp.ne.s32.totalorder %s1361_s18, %s1084_s26  ;;  %s1089_s4 = sshll.u32 %s1222_s21, 4  ;;  %s1090_s4 = int_to_ptr.vmem [resolvable:$false] %s1089_s4 }
  0x46   : > { %s1091_s6 = scalar_lea.vmem %s1090_s4, 8192  ;;  %p1092_p5 = scmp.lt.s32.totalorder %s1361_s18, %s1090_s4 }
  0x47   : > { %p1087_p11 = pnand %p1085_p12, %p1071_p3  ;;  %p1093_p9 = scmp.lt.s32.totalorder %s1091_s6, %s1084_s26 }
  0x49   : > { %p1088_p0 = pneg %p1087_p11  ;;  %p1094_p1 = por %p1093_p9, %p1092_p5 }
  0x4b   : > { %p1095_p2 = pnand %p1094_p1, %p1088_p0 }
  0x4d   : > { %1098 = shalt.err (!%p1095_p2)
}
  0x4e   : > { %977 = dma.hbm_to_vmem [thread:$0]  (!%p1365_p13), %s1359_s9, 4096, %s1361_s18, %s1369_s25, %s1220_s10, %s1220_s10, %s1221_s11  }
  0x4f   : > { %p1604_p3 = scmp.ne.s32.totalorder %s1598_s24, 0 }
  0x50   : > { %s1403_s30 = sand.u32 (!%p1604_p3), 1, %s1201_s13   ;;  %p1605_p7 = scmp.ne.s32.totalorder (!%p1604_p3), %s1596_s22, 0 }
  0x51   : > { %192 = sbr.rel (%p1604_p3) target bundleno = 441 (0x1b9), region = 28  ;;  %s773_s29 = sshll.u32 (!%p1604_p3), %s1403_s30, 8 }
  0x52   : > { %s195_s7 = scalar_lea.sflag (!%p1604_p3), [#allocation3], %s1403_s30  ;;  %s1407_s8 = scalar_lea.vmem (!%p1604_p3), [#allocation2], %s773_s29 }
  0x58   : > { %1180 = dma.done.wait (%p1605_p7), %s195_s7, 4096  }
  0x59   : > { %1182 = vsyncadd (%p1605_p7), %s195_s7, 4294963200  ;;  %p1606_p13 = scmp.ne.s32.totalorder %s1594_s20, 0 }
  0x5b   : > { %1184 = dma.done.wait (%p1606_p13), [#allocation6], 2048  }
  0x5c   : > { %1186 = vsyncadd (%p1606_p13), [#allocation6], 4294965248  ;;  %v270_v0 = vld [vmem:[#allocation5] sm:$0xff]  ;;  %v271_v1 = vld [vmem:[#allocation5 + $0x8] sm:$0xff]  ;;  %s775_s20 = sshll.u32 %s1403_s30, 3  ;;  %s779_s22 = sshll.u32 %s1209_s15, 7 }
  0x5d   : > { %v272_v2 = vld [vmem:[#allocation5 + $0x10] sm:$0xff]  ;;  %v912_v3 = vpack.c.bf16 %v271_v1, %v270_v0  ;;  %v273_v4 = vld [vmem:[#allocation5 + $0x18] sm:$0xff]  ;;  %v274_v6 = vld [vmem:[#allocation5 + $0x20] sm:$0xff]  ;;  %s222_s24 = scalar_lea.vmem [#allocation7], %s775_s20  ;;  %s1501_s11 = scalar_lea.vmem [#allocation8], %s775_s20 }
  0x5e   : > { %v916_v5 = vpack.c.bf16 %v273_v4, %v272_v2  ;;  %v275_v7 = vld [vmem:[#allocation5 + $0x28] sm:$0xff]  ;;  %v238_v9 = vld [vmem:[%s1407_s8] sm:$0xff]  ;;  %v276_v10 = vld [vmem:[#allocation5 + $0x30] sm:$0xff]  ;;  %s630_s10 = sshll.u32 %s222_s24, 4  ;;  %s643_s9 = sshll.u32 %s1501_s11, 4  ;;  %s1509_s10 = int_to_ptr.vmem [resolvable:$true] %s630_s10  ;;  %s1516_s9 = int_to_ptr.vmem [resolvable:$true] %s643_s9 }
  0x5f   : > { %913 = vmatprep.subr.bf16.mxu0 %v912_v3  ;;  %944 = vmatprep.subr.bf16.mxu1 %v912_v3  ;;  %v920_v8 = vpack.c.bf16 %v275_v7, %v274_v6  ;;  %v277_v11 = vld [vmem:[#allocation5 + $0x38] sm:$0xff]  ;;  %v278_v13 = vld [vmem:[#allocation5 + $0x40] sm:$0xff]  ;;  %v279_v14 = vld [vmem:[#allocation5 + $0x48] sm:$0xff]  ;;  %s1507_s25 = scalar_lea.hbm %s1588_s2, %s779_s22  ;;  %s1514_s21 = scalar_lea.hbm %s1589_s3, %s779_s22 }
  0x60   : > { %915 = vmatpush3.bf16.msra.mxu0 %v912_v3  ;;  %952 = vmatpush3.bf16.msra.mxu1 %v912_v3  ;;  %v924_v12 = vpack.c.bf16 %v277_v11, %v276_v10  ;;  %v254_v15 = vld [vmem:[%s1407_s8 + $0x80] sm:$0xff]  ;;  %v928_v16 = vpack.c.bf16 %v279_v14, %v278_v13  ;;  %v280_v17 = vld [vmem:[#allocation5 + $0x50] sm:$0xff]  ;;  %v281_v18 = vld [vmem:[#allocation5 + $0x58] sm:$0xff]  ;;  %s612_s4 = scalar_lea.sflag [#allocation4], %s1403_s30  ;;  %s1099_s6 = scalar_lea.vmem %s1509_s10, 128 }
  0x61   : > { %917 = vmatprep.subr.bf16.mxu0 %v916_v5  ;;  %945 = vmatprep.subr.bf16.mxu1 %v916_v5  ;;  %v932_v19 = vpack.c.bf16 %v281_v18, %v280_v17  ;;  %v282_v20 = vld [vmem:[#allocation5 + $0x60] sm:$0xff]  ;;  %v283_v21 = vld [vmem:[#allocation5 + $0x68] sm:$0xff]  ;;  %v284_v23 = vld [vmem:[#allocation5 + $0x70] sm:$0xff]  ;;  %p1100_p4 = scmp.ne.s32.totalorder %s1509_s10, %s1099_s6  ;;  %s1223_s29 = smov [#allocation7]  }
  0x62   : > { %864 = vmatprep.mubr.f32.mxu0 %v238_v9  ;;  %888 = vmatprep.mubr.f32.mxu1 %v254_v15  ;;  %v936_v22 = vpack.c.bf16 %v283_v21, %v282_v20  ;;  %v285_v24 = vld [vmem:[#allocation5 + $0x78] sm:$0xff]  ;;  %v239_v26 = vld [vmem:[%s1407_s8 + $0x8] sm:$0xff]  ;;  %v240_v28 = vld [vmem:[%s1407_s8 + $0x10] sm:$0xff]  ;;  %s1103_s7 = sshll.u32 %s1223_s29, 4  ;;  %s1104_s7 = int_to_ptr.vmem [resolvable:$false] %s1103_s7 }
  0x63   : > { %v940_v25 = vpack.c.bf16 %v285_v24, %v284_v23  ;;  %v255_v27 = vld [vmem:[%s1407_s8 + $0x88] sm:$0xff]  ;;  %v256_v29 = vld [vmem:[%s1407_s8 + $0x90] sm:$0xff]  ;;  %v241_v30 = vld [vmem:[%s1407_s8 + $0x18] sm:$0xff]  ;;  %p1101_p6 = pnand %p1100_p4, %p1344_p10  ;;  %p1106_p12 = scmp.lt.s32.totalorder %s1509_s10, %s1104_s7 }
  0x64   : > { %919 = vmatpush3.bf16.msra.mxu0 %v916_v5  ;;  %953 = vmatpush3.bf16.msra.mxu1 %v916_v5  ;;  %v257_v31 = vld [vmem:[%s1407_s8 + $0x98] sm:$0xff]  ;;  %v242_v32 = vld [vmem:[%s1407_s8 + $0x20] sm:$0xff]  ;;  %v243_v34 = vld [vmem:[%s1407_s8 + $0x28] sm:$0xff] }
  0x65   : > { %921 = vmatprep.subr.bf16.mxu0 %v920_v8  ;;  %946 = vmatprep.subr.bf16.mxu1 %v920_v8  ;;  %v258_v33 = vld [vmem:[%s1407_s8 + $0xa0] sm:$0xff]  ;;  %v259_v35 = vld [vmem:[%s1407_s8 + $0xa8] sm:$0xff]  ;;  %v244_v36 = vld [vmem:[%s1407_s8 + $0x30] sm:$0xff]  ;;  %p1102_p8 = pneg %p1101_p6 }
  0x66   : > { %v260_v37 = vld [vmem:[%s1407_s8 + $0xb0] sm:$0xff]  ;;  %v245_v38 = vld [vmem:[%s1407_s8 + $0x38] sm:$0xff]  ;;  %v246_v40 = vld [vmem:[%s1407_s8 + $0x40] sm:$0xff] }
  0x67   : > { %v261_v39 = vld [vmem:[%s1407_s8 + $0xb8] sm:$0xff]  ;;  %v262_v41 = vld [vmem:[%s1407_s8 + $0xc0] sm:$0xff]  ;;  %v247_v42 = vld [vmem:[%s1407_s8 + $0x48] sm:$0xff] }
  0x68   : > { %923 = vmatpush3.bf16.msra.mxu0 %v920_v8  ;;  %954 = vmatpush3.bf16.msra.mxu1 %v920_v8  ;;  %v263_v43 = vld [vmem:[%s1407_s8 + $0xc8] sm:$0xff]  ;;  %v248_v44 = vld [vmem:[%s1407_s8 + $0x50] sm:$0xff]  ;;  %v249_v46 = vld [vmem:[%s1407_s8 + $0x58] sm:$0xff] }
  0x69   : > { %925 = vmatprep.subr.bf16.mxu0 %v924_v12  ;;  %947 = vmatprep.subr.bf16.mxu1 %v924_v12  ;;  %v264_v45 = vld [vmem:[%s1407_s8 + $0xd0] sm:$0xff]  ;;  %v265_v47 = vld [vmem:[%s1407_s8 + $0xd8] sm:$0xff]  ;;  %v250_v48 = vld [vmem:[%s1407_s8 + $0x60] sm:$0xff] }
  0x6a   : > { %v266_v49 = vld [vmem:[%s1407_s8 + $0xe0] sm:$0xff]  ;;  %v251_v50 = vld [vmem:[%s1407_s8 + $0x68] sm:$0xff]  ;;  %v252_v52 = vld [vmem:[%s1407_s8 + $0x70] sm:$0xff] }
  0x6b   : > { %v267_v51 = vld [vmem:[%s1407_s8 + $0xe8] sm:$0xff]  ;;  %v268_v53 = vld [vmem:[%s1407_s8 + $0xf0] sm:$0xff]  ;;  %v253_v54 = vld [vmem:[%s1407_s8 + $0x78] sm:$0xff] }
  0x6c   : > { %927 = vmatpush3.bf16.msra.mxu0 %v924_v12  ;;  %955 = vmatpush3.bf16.msra.mxu1 %v924_v12  ;;  %v269_v55 = vld [vmem:[%s1407_s8 + $0xf8] sm:$0xff]  ;;  %s1105_s8 = scalar_lea.vmem %s1104_s7, 256 }
  0x6d   : > { %929 = vmatprep.subr.bf16.mxu0 %v928_v16  ;;  %948 = vmatprep.subr.bf16.mxu1 %v928_v16  ;;  %p1107_p11 = scmp.lt.s32.totalorder %s1105_s8, %s1099_s6 }
  0x6f   : > { %p1108_p0 = por %p1107_p11, %p1106_p12 }
  0x70   : > { %931 = vmatpush3.bf16.msra.mxu0 %v928_v16  ;;  %956 = vmatpush3.bf16.msra.mxu1 %v928_v16 }
  0x71   : > { %933 = vmatprep.subr.bf16.mxu0 %v932_v19  ;;  %949 = vmatprep.subr.bf16.mxu1 %v932_v19  ;;  %p1109_p5 = pnand %p1108_p0, %p1102_p8 }
  0x74   : > { %935 = vmatpush3.bf16.msra.mxu0 %v932_v19  ;;  %957 = vmatpush3.bf16.msra.mxu1 %v932_v19 }
  0x75   : > { %937 = vmatprep.subr.bf16.mxu0 %v936_v22  ;;  %950 = vmatprep.subr.bf16.mxu1 %v936_v22 }
  0x78   : > { %939 = vmatpush3.bf16.msra.mxu0 %v936_v22  ;;  %958 = vmatpush3.bf16.msra.mxu1 %v936_v22 }
  0x79   : > { %941 = vmatprep.subr.bf16.mxu0 %v940_v25  ;;  %951 = vmatprep.subr.bf16.mxu1 %v940_v25 }
  0x7c   : > { %943 = vmatpush3.bf16.msra.mxu0 %v940_v25  ;;  %959 = vmatpush3.bf16.msra.mxu1 %v940_v25 }
  0x7f   : > { %865 = vmatmul.mubr.f32.vlgmr.msra.gmra.mrb[0].mxu0 %v239_v26  ;;  %889 = vmatmul.mubr.f32.vlgmr.msra.gmra.mrb[0].mxu1 %v255_v27 }
  0x80   : > { %867 = vmatprep.mubr.f32.mxu0 %v240_v28  ;;  %891 = vmatprep.mubr.f32.mxu1 %v256_v29 }
  0x83   : > { %868 = vmatmul.mubr.f32.gmra.mrb[2].mxu0 %v241_v30  ;;  %892 = vmatmul.mubr.f32.gmra.mrb[2].mxu1 %v257_v31 }
  0x84   : > { %870 = vmatprep.mubr.f32.mxu0 %v242_v32  ;;  %894 = vmatprep.mubr.f32.mxu1 %v258_v33 }
  0x87   : > { %871 = vmatmul.mubr.f32.gmra.mrb[4].mxu0 %v243_v34  ;;  %895 = vmatmul.mubr.f32.gmra.mrb[4].mxu1 %v259_v35 }
  0x88   : > { %873 = vmatprep.mubr.f32.mxu0 %v244_v36  ;;  %897 = vmatprep.mubr.f32.mxu1 %v260_v37 }
  0x8b   : > { %874 = vmatmul.mubr.f32.gmra.mrb[6].mxu0 %v245_v38  ;;  %898 = vmatmul.mubr.f32.gmra.mrb[6].mxu1 %v261_v39 }
  0x8c   : > { %876 = vmatprep.mubr.f32.mxu0 %v246_v40  ;;  %900 = vmatprep.mubr.f32.mxu1 %v262_v41 }
  0x8f   : > { %877 = vmatmul.mubr.f32.gmra.mrb[8].mxu0 %v247_v42  ;;  %901 = vmatmul.mubr.f32.gmra.mrb[8].mxu1 %v263_v43 }
  0x90   : > { %879 = vmatprep.mubr.f32.mxu0 %v248_v44  ;;  %903 = vmatprep.mubr.f32.mxu1 %v264_v45 }
  0x93   : > { %880 = vmatmul.mubr.f32.gmra.mrb[10].mxu0 %v249_v46  ;;  %904 = vmatmul.mubr.f32.gmra.mrb[10].mxu1 %v265_v47 }
  0x94   : > { %882 = vmatprep.mubr.f32.mxu0 %v250_v48  ;;  %906 = vmatprep.mubr.f32.mxu1 %v266_v49 }
  0x97   : > { %883 = vmatmul.mubr.f32.gmra.mrb[12].mxu0 %v251_v50  ;;  %907 = vmatmul.mubr.f32.gmra.mrb[12].mxu1 %v267_v51 }
  0x98   : > { %885 = vmatprep.mubr.f32.mxu0 %v252_v52  ;;  %909 = vmatprep.mubr.f32.mxu1 %v268_v53 }
  0x9b   : > { %886 = vmatmul.mubr.f32.gmra.mrb[14].mxu0 %v253_v54  ;;  %910 = vmatmul.mubr.f32.gmra.mrb[14].mxu1 %v269_v55 }
 0x152   : > { %v866_v56 = vpop.f32.mrb[0].mxu0  ;;  %v1449_v57 = vpop.f32.mrb[0].mxu1 }
 0x153   : > { %v547_v58 = vmul.f32 %v866_v56, %v866_v56  ;;  %v352_v59 = vpop.f32.mrb[1].mxu0  ;;  %v1451_v60 = vpop.f32.mrb[1].mxu1 }
 0x154   : > { %v512_v61 = vadd.f32 %v866_v56, %v352_v59  ;;  %v546_v62 = vmul.f32 %v352_v59, %v352_v59 }
 0x156   : > { %v578_v63 = vadd.f32 %v547_v58, %v546_v62  ;;  %v869_v0 = vpop.f32.mrb[2].mxu0  ;;  %v1453_v1 = vpop.f32.mrb[2].mxu1 }
 0x157   : > { %v362_v2 = vpop.f32.mrb[3].mxu0  ;;  %v1455_v3 = vpop.f32.mrb[3].mxu1  ;;  %v549_v6 = vmul.f32 %v869_v0, %v869_v0 }
 0x158   : > { %v513_v4 = vadd.f32 %v512_v61, %v362_v2  ;;  %v548_v5 = vmul.f32 %v362_v2, %v362_v2 }
 0x15a   : > { %v579_v7 = vadd.f32 %v578_v63, %v548_v5  ;;  %v872_v8 = vpop.f32.mrb[4].mxu0  ;;  %v514_v9 = vadd.f32 %v869_v0, %v513_v4  ;;  %v1457_v10 = vpop.f32.mrb[4].mxu1 }
 0x15b   : > { %v372_v11 = vpop.f32.mrb[5].mxu0  ;;  %v1459_v12 = vpop.f32.mrb[5].mxu1  ;;  %v551_v16 = vmul.f32 %v872_v8, %v872_v8 }
 0x15c   : > { %v515_v13 = vadd.f32 %v514_v9, %v372_v11  ;;  %v550_v14 = vmul.f32 %v372_v11, %v372_v11  ;;  %v580_v15 = vadd.f32 %v579_v7, %v549_v6  ;;  %v562_v9 = vmul.f32 %v1451_v60, %v1451_v60 }
 0x15e   : > { %v581_v17 = vadd.f32 %v580_v15, %v550_v14  ;;  %v875_v18 = vpop.f32.mrb[6].mxu0  ;;  %v516_v19 = vadd.f32 %v872_v8, %v515_v13  ;;  %v1461_v20 = vpop.f32.mrb[6].mxu1  ;;  %v563_v14 = vmul.f32 %v1449_v57, %v1449_v57 }
 0x15f   : > { %v382_v21 = vpop.f32.mrb[7].mxu0  ;;  %v1463_v22 = vpop.f32.mrb[7].mxu1  ;;  %v553_v26 = vmul.f32 %v875_v18, %v875_v18 }
 0x160   : > { %v517_v23 = vadd.f32 %v516_v19, %v382_v21  ;;  %v552_v24 = vmul.f32 %v382_v21, %v382_v21  ;;  %v582_v25 = vadd.f32 %v581_v17, %v551_v16  ;;  %v564_v17 = vmul.f32 %v1455_v3, %v1455_v3 }
 0x161   : > { %v565_v21 = vmul.f32 %v1453_v1, %v1453_v1 }
 0x162   : > { %v583_v27 = vadd.f32 %v582_v25, %v552_v24  ;;  %v878_v28 = vpop.f32.mrb[8].mxu0  ;;  %v518_v29 = vadd.f32 %v875_v18, %v517_v23  ;;  %v1465_v30 = vpop.f32.mrb[8].mxu1 }
 0x163   : > { %v392_v31 = vpop.f32.mrb[9].mxu0  ;;  %v472_v32 = vpop.f32.mrb[9].mxu1  ;;  %v555_v36 = vmul.f32 %v878_v28, %v878_v28 }
 0x164   : > { %v519_v33 = vadd.f32 %v518_v29, %v392_v31  ;;  %v554_v34 = vmul.f32 %v392_v31, %v392_v31  ;;  %v584_v35 = vadd.f32 %v583_v27, %v553_v26 }
 0x166   : > { %v585_v37 = vadd.f32 %v584_v35, %v554_v34  ;;  %v881_v38 = vpop.f32.mrb[10].mxu0  ;;  %v520_v39 = vadd.f32 %v878_v28, %v519_v33  ;;  %v1467_v40 = vpop.f32.mrb[10].mxu1  ;;  %v570_v34 = vmul.f32 %v472_v32, %v472_v32 }
 0x167   : > { %v402_v41 = vpop.f32.mrb[11].mxu0  ;;  %v482_v42 = vpop.f32.mrb[11].mxu1  ;;  %v557_v46 = vmul.f32 %v881_v38, %v881_v38 }
 0x168   : > { %v521_v43 = vadd.f32 %v520_v39, %v402_v41  ;;  %v556_v44 = vmul.f32 %v402_v41, %v402_v41  ;;  %v586_v45 = vadd.f32 %v585_v37, %v555_v36  ;;  %v571_v37 = vmul.f32 %v1465_v30, %v1465_v30 }
 0x169   : > { %v572_v39 = vmul.f32 %v482_v42, %v482_v42 }
 0x16a   : > { %v587_v47 = vadd.f32 %v586_v45, %v556_v44  ;;  %v884_v48 = vpop.f32.mrb[12].mxu0  ;;  %v522_v49 = vadd.f32 %v881_v38, %v521_v43  ;;  %v908_v50 = vpop.f32.mrb[12].mxu1  ;;  %v573_v43 = vmul.f32 %v1467_v40, %v1467_v40 }
 0x16b   : > { %v412_v51 = vpop.f32.mrb[13].mxu0  ;;  %v492_v52 = vpop.f32.mrb[13].mxu1  ;;  %v559_v56 = vmul.f32 %v884_v48, %v884_v48 }
 0x16c   : > { %v523_v53 = vadd.f32 %v522_v49, %v412_v51  ;;  %v558_v54 = vmul.f32 %v412_v51, %v412_v51  ;;  %v588_v55 = vadd.f32 %v587_v47, %v557_v46  ;;  %v575_v47 = vmul.f32 %v908_v50, %v908_v50 }
 0x16e   : > { %v589_v58 = vadd.f32 %v588_v55, %v558_v54  ;;  %v887_v59 = vpop.f32.mrb[14].mxu0  ;;  %v524_v61 = vadd.f32 %v884_v48, %v523_v53  ;;  %v911_v62 = vpop.f32.mrb[14].mxu1 }
 0x16f   : > { %v422_v63 = vpop.f32.mrb[15].mxu0  ;;  %v502_v0 = vpop.f32.mrb[15].mxu1  ;;  %v561_v6 = vmul.f32 %v887_v59, %v887_v59 }
 0x170   : > { %v525_v2 = vadd.f32 %v524_v61, %v422_v63  ;;  %v560_v4 = vmul.f32 %v422_v63, %v422_v63  ;;  %v590_v5 = vadd.f32 %v589_v58, %v559_v56  ;;  %v576_v51 = vmul.f32 %v502_v0, %v502_v0 }
 0x172   : > { %v526_v7 = vadd.f32 %v887_v59, %v525_v2  ;;  %v591_v8 = vadd.f32 %v590_v5, %v560_v4 }
 0x174   : > { %v592_v11 = vadd.f32 %v591_v8, %v561_v6  ;;  %v527_v13 = vadd.f32 %v526_v7, %v1451_v60  ;;  %v566_v60 = vmul.f32 %v1459_v12, %v1459_v12 }
 0x176   : > { %v593_v15 = vadd.f32 %v592_v11, %v562_v9  ;;  %v528_v16 = vadd.f32 %v1449_v57, %v527_v13  ;;  %v567_v57 = vmul.f32 %v1457_v10, %v1457_v10 }
 0x178   : > { %v529_v18 = vadd.f32 %v528_v16, %v1455_v3  ;;  %v594_v19 = vadd.f32 %v593_v15, %v563_v14  ;;  %v568_v3 = vmul.f32 %v1463_v22, %v1463_v22 }
 0x17a   : > { %v595_v23 = vadd.f32 %v594_v19, %v564_v17  ;;  %v530_v24 = vadd.f32 %v1453_v1, %v529_v18  ;;  %v569_v1 = vmul.f32 %v1461_v20, %v1461_v20 }
 0x17c   : > { %v531_v25 = vadd.f32 %v530_v24, %v1459_v12  ;;  %v596_v26 = vadd.f32 %v595_v23, %v565_v21 }
 0x17e   : > { %v597_v27 = vadd.f32 %v596_v26, %v566_v60  ;;  %v532_v28 = vadd.f32 %v1457_v10, %v531_v25 }
 0x180   : > { %v533_v29 = vadd.f32 %v532_v28, %v1463_v22  ;;  %v598_v31 = vadd.f32 %v597_v27, %v567_v57 }
 0x182   : > { %v599_v33 = vadd.f32 %v598_v31, %v568_v3  ;;  %v534_v12 = vadd.f32 %v1461_v20, %v533_v29  ;;  %v574_v20 = vmul.f32 %v492_v52, %v492_v52 }
 0x184   : > { %v535_v35 = vadd.f32 %v534_v12, %v472_v32  ;;  %v600_v36 = vadd.f32 %v599_v33, %v569_v1 }
 0x186   : > { %v601_v10 = vadd.f32 %v600_v36, %v570_v34  ;;  %v536_v38 = vadd.f32 %v1465_v30, %v535_v35 }
 0x188   : > { %v537_v22 = vadd.f32 %v536_v38, %v482_v42  ;;  %v602_v41 = vadd.f32 %v601_v10, %v571_v37  ;;  %v577_v42 = vmul.f32 %v911_v62, %v911_v62 }
 0x18a   : > { %v603_v44 = vadd.f32 %v602_v41, %v572_v39  ;;  %v538_v45 = vadd.f32 %v1467_v40, %v537_v22 }
 0x18c   : > { %v539_v32 = vadd.f32 %v538_v45, %v492_v52  ;;  %v604_v46 = vadd.f32 %v603_v44, %v573_v43 }
 0x18e   : > { %v605_v48 = vadd.f32 %v604_v46, %v574_v20  ;;  %v540_v49 = vadd.f32 %v908_v50, %v539_v32 }
 0x190   : > { %v541_v53 = vadd.f32 %v540_v49, %v502_v0  ;;  %v606_v30 = vadd.f32 %v605_v48, %v575_v47 }
 0x192   : > { %v542_v54 = vadd.f32 %v911_v62, %v541_v53  ;;  %v607_v55 = vadd.f32 %v606_v30, %v576_v51 }
 0x194   : > { %v608_v40 = vadd.f32 %v607_v55, %v577_v42  ;;  %544 = vst [vmem:[%s222_s24] sm:$0xff] %v542_v54 }
 0x195   : > { %1112 = shalt.err (!%p1109_p5)
}
 0x196   : > { %s1113_s20 = scalar_lea.hbm %s1507_s25, 128  ;;  %s1117_s18 = scalar_lea.hbm %s1588_s2, 256 }
 0x197   : > { %p1114_p9 = scmp.ne.s32.totalorder %s1507_s25, %s1113_s20  ;;  %p1118_p3 = scmp.lt.u32.totalorder %s1507_s25, %s1588_s2 }
 0x198   : > { %p1119_p7 = scmp.lt.u32.totalorder %s1117_s18, %s1113_s20  ;;  %p1121_p4 = scmp.lt.u32.totalorder %s1113_s20, %s1507_s25 }
 0x199   : > { %p1115_p1 = pnand %p1114_p9, %p1344_p10 }
 0x19a   : > { %p1120_p13 = por %p1119_p7, %p1118_p3 }
 0x19b   : > { %p1116_p2 = pneg %p1115_p1 }
 0x19c   : > { %p1122_p6 = por %p1121_p4, %p1120_p13 }
 0x19e   : > { %p1123_p8 = pnand %p1122_p6, %p1116_p2 }
 0x1a0   : > { %1126 = shalt.err (!%p1123_p8)
}
 0x1a1   : > { %966 = dma.vmem_to_hbm [thread:$0]  (%p1344_p10), %s1509_s10, 128, %s1507_s25, %s612_s4   ;;  %610 = vst [vmem:[%s1501_s11] sm:$0xff] %v608_v40 }
 0x1a2   : > { %s617_s26 = scalar_lea.sflag [#allocation9], %s1403_s30  ;;  %s1127_s6 = scalar_lea.vmem %s1516_s9, 128 }
 0x1a3   : > { %p1128_p12 = scmp.ne.s32.totalorder %s1516_s9, %s1127_s6  ;;  %s1224_s29 = smov [#allocation8]  }
 0x1a4   : > { %s1131_s7 = sshll.u32 %s1224_s29, 4  ;;  %s1132_s7 = int_to_ptr.vmem [resolvable:$false] %s1131_s7 }
 0x1a5   : > { %p1129_p11 = pnand %p1128_p12, %p1344_p10  ;;  %s1133_s8 = scalar_lea.vmem %s1132_s7, 256 }
 0x1a6   : > { %p1134_p5 = scmp.lt.s32.totalorder %s1516_s9, %s1132_s7  ;;  %p1135_p9 = scmp.lt.s32.totalorder %s1133_s8, %s1127_s6 }
 0x1a7   : > { %p1130_p0 = pneg %p1129_p11 }
 0x1a8   : > { %p1136_p1 = por %p1135_p9, %p1134_p5 }
 0x1aa   : > { %p1137_p2 = pnand %p1136_p1, %p1130_p0 }
 0x1ac   : > { %1140 = shalt.err (!%p1137_p2)
}
 0x1ad   : > { %s1141_s30 = scalar_lea.hbm %s1514_s21, 128  ;;  %s1145_s25 = scalar_lea.hbm %s1589_s3, 256 }
 0x1ae   : > { %p1142_p3 = scmp.ne.s32.totalorder %s1514_s21, %s1141_s30  ;;  %p1146_p4 = scmp.lt.u32.totalorder %s1514_s21, %s1589_s3 }
 0x1af   : > { %p1147_p6 = scmp.lt.u32.totalorder %s1145_s25, %s1141_s30  ;;  %p1149_p12 = scmp.lt.u32.totalorder %s1141_s30, %s1514_s21 }
 0x1b0   : > { %p1143_p7 = pnand %p1142_p3, %p1344_p10 }
 0x1b1   : > { %p1148_p8 = por %p1147_p6, %p1146_p4 }
 0x1b2   : > { %p1144_p13 = pneg %p1143_p7 }
 0x1b3   : > { %p1150_p11 = por %p1149_p12, %p1148_p8 }
 0x1b5   : > { %p1151_p0 = pnand %p1150_p11, %p1144_p13 }
 0x1b7   : > { %1154 = shalt.err (!%p1151_p0)
}
 0x1b8   : > { %967 = dma.vmem_to_hbm [thread:$0]  (%p1344_p10), %s1516_s9, 128, %s1514_s21, %s617_s26  }
 0x1b9 PF: > { %s655_s22 = sand.u32 1, %s1197_s12   ;;  %p1607_p5 = scmp.ne.s32.totalorder %s1597_s23, 0 }
 0x1ba   : > { %p1608_p9 = scmp.ge.s32.totalorder %s1217_s17, 2  ;;  %s656_s24 = scalar_lea.sflag [#allocation4], %s655_s22 }
 0x1bc   : > { %p979_p1 = pnand %p1608_p9, %p1607_p5 }
 0x1be   : > { %1188 = dma.done.wait (!%p979_p1), %s656_s24, 128  }
 0x1bf   : > { %1190 = vsyncadd (!%p979_p1), %s656_s24, 4294967168  ;;  %s665_s18 = scalar_lea.sflag [#allocation9], %s655_s22 }
 0x1c0   : > { %1192 = dma.done.wait (!%p979_p1), %s665_s18, 128  }
 0x1c1   : > { %1194 = vsyncadd (!%p979_p1), %s665_s18, 4294967168  ;;  %s24_s17 = sadd.s32 1, %s1217_s17   ;;  %s1609_s12 = smov %s1201_s13 }
 0x1c2   : > { %p21_p2 = scmp.ge.s32.totalorder %s24_s17, 4   ;;  %s1610_s13 = smov %s1205_s14 }
 0x1c3   : > { %s1611_s14 = smov %s1353_s5  ;;  %s1612_s15 = smov %s1213_s16 }
 0x1c4   : > { %s1613_s16 = smov %s1615_s28  ;;  %23 = sbr.rel (!%p21_p2) target bundleno = 9 (0x9), region = 98 }
 0x1cb   :  { %670 = vsyncpa [#allocation3], 1 }
 0x1cc   :  { %672 = vsyncpa [#allocation3 + $0x1], 1 }
 0x1cd   :  { %673 = vsyncpa [#allocation6], 1 }
 0x1ce   :  { %674 = vsyncpa [#allocation4], 1 }
 0x1cf   :  { %676 = vsyncpa [#allocation4 + $0x1], 1 }
 0x1d0   :  { %677 = vsyncpa [#allocation9], 1 }
 0x1d1   :  { %679 = vsyncpa [#allocation9 + $0x1], 1 }

</bundles_post_ra>
